<compile_context>
chip_gen: v7x
topology: tpu7x:2x2x1
jax: 0.10.0
libtpu: 0.0.40
codegen_flags: <defaults>
</compile_context>

<pallas_src>
import math

import jax
import jax.numpy as jnp
from jax.experimental import pallas as pl
from jax.experimental.pallas import tpu as pltpu


_VMEM_PLAN_BUDGET = 32 << 20   # total tile plan (<= v7x 64 MiB/TC with margin)
_VMEM_LIMIT_CAP = 48 << 20     # scoped-VMEM request cap


# ---------------------------------------------------------------------------
# Kernel: one row-tile of the folded affine map.
#   out[r] = cast(x2[r]) @ Wc + Mtile[r - tile_start]      (f32 accumulate)
# ---------------------------------------------------------------------------
def _make_kernel(compute_dtype):
    def _vap_kernel(x2_ref, wc_ref, mtile_ref, o_ref):
        x2 = x2_ref[...].astype(compute_dtype)            # in-kernel cast (VPU)
        acc = jnp.dot(x2, wc_ref[...],
                      preferred_element_type=jnp.float32)  # (tm, H) f32 on MXU
        o_ref[...] = (acc + mtile_ref[...].astype(jnp.float32)).astype(o_ref.dtype)
    return _vap_kernel


# ---------------------------------------------------------------------------
# One-time parameter folding (parameter-setup time, not per call).
#   w1: (I, 2H) torch Linear weight, b1: (I,)
#   w2: (H, H+I) torch Linear weight, b2: (H,)
# On v5e use compute_dtype=jnp.bfloat16 (f32 MXU there is far off peak).
# ---------------------------------------------------------------------------
def fold_params(w1, b1, w2, b2, hidden_size, compute_dtype=jnp.float32):
    h = hidden_size
    w1 = w1.astype(jnp.float32)
    w2 = w2.astype(jnp.float32)
    b1 = b1.astype(jnp.float32)
    b2 = b2.astype(jnp.float32)

    w1a = w1[:, :h].T          # (H, I)  acts on x1 (tiled mean)
    w1b = w1[:, h:].T          # (H, I)  acts on x2
    w2a = w2[:, :h].T          # (H, H)  acts on x2
    w2b = w2[:, h:].T          # (I, H)  acts on v

    wc = w2a + w1b @ w2b       # (H, H)  folded weight applied to x2
    wm = w1a @ w2b             # (H, H)  folded weight applied to mean(z, 1)
    b_fused = b1 @ w2b + b2    # (H,)

    # TODO(synk): if production H is ever not a multiple of 128, pad Wc / the
    # output lane dim here to avoid masked vst partial stores (H=768 is fine).
    return wc.astype(compute_dtype), wm, b_fused


# ---------------------------------------------------------------------------
# Row-tile selection: divides N, multiple of lcm(sublane, B) (mean pattern
# identical per tile + sublane-aligned sub-blocks), sized from an explicit
# VMEM plan, preferring an even grid length (v7x two-TC split).
# ---------------------------------------------------------------------------
def _choose_row_tile(n, batch, *, sublane, per_row_bytes, fixed_bytes,
                     vmem_budget=_VMEM_PLAN_BUDGET):
    base = sublane * batch // math.gcd(sublane, batch)   # lcm(sublane, batch)
    if base > n or n % base:
        # TODO(synk): pad N (or relax the divisibility) instead of a full-extent
        # block here; for very large N this single block is a VMEM-OOM hazard.
        return n
    avail = max(vmem_budget - fixed_bytes, base * per_row_bytes)
    max_rows = max(base, avail // max(1, per_row_bytes))
    valid = [d for d in range(base, n + 1, base) if n % d == 0]
    fitting = [d for d in valid if d <= max_rows]
    if not fitting:
        return min(valid)
    best = max(fitting)
    # Prefer an even grid length (>=2 steps) so v7x's two TensorCores split the
    # parallel axis evenly, unless that would more than halve the tile.
    even = [d for d in fitting if (n // d) % 2 == 0]
    if even and max(even) * 2 >= best:
        return max(even)
    return best


# ---------------------------------------------------------------------------
# Forward pass. `folded` = fold_params(...) output; z: (B, S, H).
# ---------------------------------------------------------------------------
def vector_adjust_prior(z, folded, *, row_tile=None, out_dtype=None):
    wc, wm, b_fused = folded
    b, s, h = z.shape
    n = b * s
    compute_dtype = wc.dtype
    out_dtype = z.dtype if out_dtype is None else out_dtype
    # mtile in the compute dtype on the low-precision path (upcast in the f32
    # add is free); f32 otherwise.
    mtile_dtype = compute_dtype if jnp.dtype(compute_dtype).itemsize < 4 else jnp.float32

    # Tiny per-call prep (O(B*H^2) + one reduction over z), left to XLA.
    mean = jnp.mean(z, axis=1).astype(jnp.float32)            # (B, H)
    m = mean @ wm + b_fused                                   # (B, H) f32, bias folded in
    x2 = z.reshape(n, h)                                      # no cast: cast in-kernel

    # Sublane alignment of the row-tiled streams (x2 and out).
    min_itemsize = min(jnp.dtype(z.dtype).itemsize, jnp.dtype(out_dtype).itemsize)
    sublane = 8 * max(1, 4 // min_itemsize)

    # VMEM plan: x2 + out double-buffered row streams, Wc + mtile single-buffered.
    per_row_bytes = h * (2 * jnp.dtype(z.dtype).itemsize
                         + 2 * jnp.dtype(out_dtype).itemsize
                         + jnp.dtype(mtile_dtype).itemsize)
    fixed_bytes = h * h * jnp.dtype(compute_dtype).itemsize

    tm = row_tile if row_tile is not None else _choose_row_tile(
        n, b, sublane=sublane, per_row_bytes=per_row_bytes, fixed_bytes=fixed_bytes)
    assert n % tm == 0, "row tile must divide B*S"
    assert tm % b == 0, "row tile must be a multiple of B (mean.repeat pattern)"

    # The r % B mean pattern is identical in every tile -> one resident tile.
    mtile = jnp.tile(m, (tm // b, 1)).astype(mtile_dtype)     # (tm, H)

    plan_bytes = fixed_bytes + tm * per_row_bytes
    vmem_limit = plan_bytes + (8 << 20)
    vmem_limit = max(vmem_limit, 16 << 20)
    vmem_limit = min(vmem_limit, _VMEM_LIMIT_CAP)
    vmem_limit = int(max(vmem_limit, plan_bytes + (1 << 20)))  # never starve the plan

    out = pl.pallas_call(
        _make_kernel(compute_dtype),
        out_shape=jax.ShapeDtypeStruct((n, h), out_dtype),
        grid_spec=pltpu.PrefetchScalarGridSpec(
            num_scalar_prefetch=0,
            grid=(n // tm,),
            in_specs=[
                # x2 row stream: default double-buffered pipeline.
                pl.BlockSpec((tm, h), lambda i: (i, 0)),
                # Folded weight: grid-invariant -> single buffer.
                pl.BlockSpec((h, h), lambda i: (0, 0),
                             pipeline_mode=pl.Buffered(1)),
                # Mean-term tile: grid-invariant -> single buffer.
                pl.BlockSpec((tm, h), lambda i: (0, 0),
                             pipeline_mode=pl.Buffered(1)),
            ],
            out_specs=pl.BlockSpec((tm, h), lambda i: (i, 0)),
        ),
        compiler_params=pltpu.CompilerParams(
            dimension_semantics=("parallel",),
            vmem_limit_bytes=vmem_limit),
    )(x2, wc, mtile)

    return out.reshape(b, s, h)


# ---------------------------------------------------------------------------
# Pure-JAX transcription of the PyTorch forward (including the repeat quirk).
# ---------------------------------------------------------------------------
def _reference(z, w1, b1, w2, b2):
    b, s, h = z.shape
    x1 = jnp.tile(jnp.mean(z, axis=1), (s, 1))
    x2 = z.reshape(b * s, h)
    x = jnp.concatenate([x1, x2], axis=1)
    x = x @ w1.T + b1
    x = jnp.concatenate([x2, x], axis=1)
    x = x @ w2.T + b2
    return x.reshape(b, s, -1)


if __name__ == "__main__":
    B, S, H, INTER = 2, 8, 32, 64

    key = jax.random.PRNGKey(0)
    kz, kw1, kb1, kw2, kb2 = jax.random.split(key, 5)

    z = jax.random.normal(kz, (B, S, H), dtype=jnp.float32)
    # nn.Linear shapes: weight (out_features, in_features).
    w1 = jax.random.normal(kw1, (INTER, 2 * H), dtype=jnp.float32) * 0.05
    b1 = jax.random.normal(kb1, (INTER,), dtype=jnp.float32) * 0.05
    w2 = jax.random.normal(kw2, (H, H + INTER), dtype=jnp.float32) * 0.05
    b2 = jax.random.normal(kb2, (H,), dtype=jnp.float32) * 0.05

    ref = _reference(z, w1, b1, w2, b2)

    # f32 compute path (tight check; folding only changes summation order).
    folded_f32 = fold_params(w1, b1, w2, b2, H, compute_dtype=jnp.float32)
    out_f32 = jax.block_until_ready(vector_adjust_prior(z, folded_f32))
    assert out_f32.shape == (B, S, H)
    assert jnp.allclose(out_f32, ref, atol=1e-4, rtol=1e-4)

    # bf16 MXU path (preferred on v5e): f32 accumulate + f32 bias add.
    folded_bf16 = fold_params(w1, b1, w2, b2, H, compute_dtype=jnp.bfloat16)
    out_bf16 = jax.block_until_ready(vector_adjust_prior(z, folded_bf16))
    assert out_bf16.shape == (B, S, H)
    assert jnp.allclose(out_bf16, ref, atol=5e-2, rtol=5e-2)

    # bf16 output path (HBM-bound at production H=768 -> ~33% fewer out bytes).
    out_bf16o = jax.block_until_ready(
        vector_adjust_prior(z, folded_bf16, out_dtype=jnp.bfloat16))
    assert out_bf16o.shape == (B, S, H)
    assert out_bf16o.dtype == jnp.bfloat16
    assert jnp.allclose(out_bf16o.astype(jnp.float32), ref, atol=5e-2, rtol=5e-2)

    # TODO(synk): for hidden sizes not a multiple of 128 (demo H=32) the store
    # path uses masked vst; the production H=768 is already lane-dense.
    print("KERNEL_OK")
</pallas_src>

<mosaic_0001>
module attributes {stable_mosaic.version = 11 : i64} {
  func.func @_vap_kernel(%arg0: i32, %arg1: memref<8x32xf32, #tpu.memory_space<vmem>>, %arg2: memref<32x32xf32, #tpu.memory_space<vmem>>, %arg3: memref<8x32xf32, #tpu.memory_space<vmem>>, %arg4: memref<8x32xf32, #tpu.memory_space<vmem>>) attributes {dimension_semantics = [#tpu.dimension_semantics<parallel>], iteration_bounds = array<i64: 2>, scalar_prefetch = 0 : i64, scratch_operands = 0 : i64, tpu.core_type = #tpu.core_type<tc>, window_params = [{transform_indices = @transform_0, window_bounds = array<i64: 8, 32>}, {pipeline_mode = #tpu.pipeline_mode<synchronous>, transform_indices = @transform_1, window_bounds = array<i64: 32, 32>}, {pipeline_mode = #tpu.pipeline_mode<synchronous>, transform_indices = @transform_2, window_bounds = array<i64: 8, 32>}, {transform_indices = @transform_3, window_bounds = array<i64: 8, 32>}]} {
    %c0 = arith.constant 0 : index
    %c0_0 = arith.constant 0 : index
    %0 = vector.load %arg1[%c0, %c0_0] : memref<8x32xf32, #tpu.memory_space<vmem>>, vector<8x32xf32>
    %c0_1 = arith.constant 0 : index
    %c0_2 = arith.constant 0 : index
    %1 = vector.load %arg2[%c0_1, %c0_2] : memref<32x32xf32, #tpu.memory_space<vmem>>, vector<32x32xf32>
    %cst = arith.constant dense<0.000000e+00> : vector<8x32xf32>
    %2 = tpu.matmul %0, %1, %cst {dimension_numbers = #tpu.dot_dimension_numbers<[1], [0], [0], [1], [0, 0, 1, 1], [], []>} : vector<8x32xf32>, vector<32x32xf32>, vector<8x32xf32> -> vector<8x32xf32>
    %c0_3 = arith.constant 0 : index
    %c0_4 = arith.constant 0 : index
    %3 = vector.load %arg3[%c0_3, %c0_4] : memref<8x32xf32, #tpu.memory_space<vmem>>, vector<8x32xf32>
    %4 = arith.addf %2, %3 : vector<8x32xf32>
    %c0_5 = arith.constant 0 : index
    %c0_6 = arith.constant 0 : index
    %5 = vector.load %arg4[%c0_5, %c0_6] : memref<8x32xf32, #tpu.memory_space<vmem>>, vector<8x32xf32>
    tpu.vector_store %arg4[%c0_5, %c0_6], %4 {strides = array<i32>} : memref<8x32xf32, #tpu.memory_space<vmem>>, vector<8x32xf32>,
    return
  }
  func.func @transform_0(%arg0: i32) -> (i32, i32) {
    %c0_i32 = arith.constant 0 : i32
    %c0_i32_0 = arith.constant 0 : i32
    return %arg0, %c0_i32 : i32, i32
  }
  func.func @transform_1(%arg0: i32) -> (i32, i32) {
    %c0_i32 = arith.constant 0 : i32
    %c0_i32_0 = arith.constant 0 : i32
    %c0_i32_1 = arith.constant 0 : i32
    return %c0_i32, %c0_i32_0 : i32, i32
  }
  func.func @transform_2(%arg0: i32) -> (i32, i32) {
    %c0_i32 = arith.constant 0 : i32
    %c0_i32_0 = arith.constant 0 : i32
    %c0_i32_1 = arith.constant 0 : i32
    return %c0_i32, %c0_i32_0 : i32, i32
  }
  func.func @transform_3(%arg0: i32) -> (i32, i32) {
    %c0_i32 = arith.constant 0 : i32
    %c0_i32_0 = arith.constant 0 : i32
    return %arg0, %c0_i32 : i32, i32
  }
}

</mosaic_0001>

<bundles_post_ra>
// kernel: tpu_custom_call.1
= control target key start
LH: loop header
LB: loop body
LE: loop exit
PB: predicated region body
PF: predicated region fallthrough
CT: control target
= control target key end

     0   :  { %8 = vsyncpa [#allocation3], 0  ;;  %s924_s0 = inlined_call_operand.hbm [shape: f32[16,32], index: 0, kind: input, shape index: {}]   ;;  %s925_s1 = inlined_call_operand.hbm [shape: f32[32,32], index: 1, kind: input, shape index: {}]   ;;  %s926_s2 = inlined_call_operand.hbm [shape: f32[8,32], index: 2, kind: input, shape index: {}]   ;;  %s927_s3 = inlined_call_operand.hbm [shape: f32[16,32], index: 3, kind: output, shape index: {}]  }
   0x1   :  { %10 = vsyncpa [#allocation3 + $0x1], 0 }
   0x2   :  { %11 = vsyncpa [#allocation6], 0 }
   0x3   :  { %12 = vsyncpa [#allocation4], 0 }
   0x4   :  { %14 = vsyncpa [#allocation4 + $0x1], 0  ;;  %s695_s12 = smov 0   ;;  %s697_s13 = smov 0  }
   0x5   :  { %s699_s14 = smov 0   ;;  %s701_s15 = smov 0  }
   0x6 LB: > { %s716_s16 = sadd.s32 4294967295, %s664_s15   ;;  %s397_s17 = sadd.s32 4294967294, %s664_s15   ;;  %s664_s15 = sphi %s701_s15, %s947_s15   ;;  %s660_s14 = sphi %s699_s14, %s946_s14   ;;  %s656_s13 = sphi %s697_s13, %s945_s13   ;;  %s652_s12 = sphi %s695_s12, %s944_s12  }
   0x7   : > { %p40_p0 = scmp.ne.s32.totalorder %s656_s13, %s652_s12  ;;  %p928_p1 = scmp.eq.s32.totalorder %s716_s16, 0 }
   0x8   : > { %p112_p3 = scmp.eq.s32.totalorder %s397_s17, 1  ;;  %p398_p5 = scmp.ge.s32.totalorder %s664_s15, 1 }
   0x9   : > { %p725_p4 = por %p928_p1, %p40_p0  ;;  %p119_p7 = scmp.lt.s32.totalorder %s664_s15, 3 }
   0xa   : > { %p730_p6 = por %p112_p3, %p40_p0  ;;  %s666_s21 = smov [#allocation5]  }
   0xb   : > { %s931_s18 = scalar_select %p725_p4, 1, 0 }
   0xc   : > { %s932_s19 = scalar_select %p730_p6, 1, 0 }
   0xd   : > { %p735_p8 = pnand %p398_p5, %p119_p7  ;;  %s131_s22 = sshll.u32 %s666_s21, 4  ;;  %s739_s22 = int_to_ptr.vmem [resolvable:$true] %s131_s22 }
   0xe   : > { %s667_s24 = smov [#allocation7]   ;;  %s508_s28 = scalar_lea.hbm %s925_s1, 512 }
   0xf   : > { %p448_p9 = pneg %p735_p8  ;;  %s145_s25 = sshll.u32 %s667_s24, 4  ;;  %s750_s25 = int_to_ptr.vmem [resolvable:$true] %s145_s25 }
  0x10   : > { %p509_p12 = scmp.ne.s32.totalorder %s925_s1, %s508_s28  ;;  %p515_p5 = scmp.lt.u32.totalorder %s508_s28, %s925_s1 }
  0x11   : > { %p746_p11 = pnand %p448_p9, %p928_p1 }
  0x13   : > { %p510_p13 = pneg %p746_p11 }
  0x15   : > { %p511_p0 = pnand %p510_p13, %p509_p12 }
  0x17   : > { %p512_p3 = pneg %p511_p0 }
  0x19   : > { %p517_p7 = pnand %p515_p5, %p512_p3 }
  0x1b   : > { %520 = shalt.err (!%p517_p7)
}
  0x1c   : > { %s521_s6 = scalar_lea.vmem %s739_s22, 512  ;;  %p529_p2 = scmp.lt.s32.totalorder %s739_s22, %s739_s22 }
  0x1d   : > { %p522_p9 = scmp.ne.s32.totalorder %s739_s22, %s521_s6  ;;  %p530_p12 = scmp.lt.s32.totalorder %s521_s6, %s521_s6 }
  0x1f   : > { %p524_p10 = pnand %p522_p9, %p510_p13  ;;  %p531_p0 = por %p530_p12, %p529_p2 }
  0x21   : > { %p525_p1 = pneg %p524_p10 }
  0x23   : > { %p532_p6 = pnand %p531_p0, %p525_p1 }
  0x25   : > { %535 = shalt.err (!%p532_p6)
}
  0x26   : > { %s668_s7 = smov 128   ;;  %s669_s8 = smov 8  }
  0x27   : > { %451 = dma.hbm_to_vmem [thread:$0]  (!%p746_p11), %s925_s1, 512, %s739_s22, [#allocation6], %s668_s7, %s668_s7, %s669_s8  }
  0x28   : > { %s536_s21 = scalar_lea.hbm %s926_s2, 128 }
  0x29   : > { %p537_p2 = scmp.ne.s32.totalorder %s926_s2, %s536_s21  ;;  %p543_p10 = scmp.lt.u32.totalorder %s536_s21, %s926_s2 }
  0x2b   : > { %p539_p1 = pnand %p537_p2, %p510_p13 }
  0x2d   : > { %p540_p6 = pneg %p539_p1 }
  0x2f   : > { %p545_p3 = pnand %p543_p10, %p540_p6 }
  0x31   : > { %548 = shalt.err (!%p545_p3)
}
  0x32   : > { %s549_s22 = scalar_lea.vmem %s750_s25, 128  ;;  %p557_p12 = scmp.lt.s32.totalorder %s750_s25, %s750_s25 }
  0x33   : > { %p550_p5 = scmp.ne.s32.totalorder %s750_s25, %s549_s22  ;;  %p558_p0 = scmp.lt.s32.totalorder %s549_s22, %s549_s22 }
  0x35   : > { %p552_p7 = pnand %p550_p5, %p510_p13  ;;  %p559_p2 = por %p558_p0, %p557_p12 }
  0x37   : > { %p553_p9 = pneg %p552_p7 }
  0x39   : > { %p560_p1 = pnand %p559_p2, %p553_p9 }
  0x3b   : > { %563 = shalt.err (!%p560_p1)
}
  0x3c   : > { %454 = dma.hbm_to_vmem [thread:$0]  (!%p746_p11), %s926_s2, 128, %s750_s25, [#allocation6]  }
  0x3d   : > { %s805_s4 = sadd.s32 1, %s664_s15   ;;  %s27_s23 = sadd.s32 1, %s660_s14 }
  0x3e   : > { %s24_s5 = ssub.s32 %s664_s15, %s805_s4  ;;  %p34_p13 = scmp.ne.s32.totalorder %s660_s14, %s656_s13 }
  0x3f   : > { %p25_p6 = scmp.eq.s32.totalorder %s24_s5, 0  ;;  %p35_p10 = scmp.eq.s32.totalorder %s664_s15, 0 }
  0x40   : > { %p935_p3 = scmp.eq.s32.totalorder %s716_s16, 1  ;;  %p465_p7 = scmp.lt.s32.totalorder %s664_s15, 2 }
  0x41   : > { %s821_s7 = scalar_select %p25_p6, %s660_s14, %s27_s23  }
  0x42   : > { %p815_p5 = por %p935_p3, %p34_p13  ;;  %p36_p9 = por %p35_p10, %p34_p13 }
  0x43   : > { %s156_s8 = sand.u32 1, %s660_s14   ;;  %s403_s25 = sshll.u32 %s664_s15, 7 }
  0x44   : > { %s936_s6 = scalar_select %p815_p5, 1, 0 }
  0x45   : > { %s402_s9 = sshll.u32 %s156_s8, 3  ;;  %s828_s17 = scalar_lea.hbm %s924_s0, %s403_s25 }
  0x46   : > { %s160_s21 = scalar_lea.vmem [#allocation2], %s402_s9  ;;  %p832_p11 = pnand %p465_p7, %p36_p9 }
  0x47   : > { %s167_s24 = sshll.u32 %s160_s21, 4  ;;  %s157_s27 = scalar_lea.sflag [#allocation3], %s156_s8  ;;  %s830_s24 = int_to_ptr.vmem [resolvable:$true] %s167_s24 }
  0x48   : > { %s564_s28 = scalar_lea.hbm %s828_s17, 128  ;;  %p566_p0 = pneg %p832_p11 }
  0x49   : > { %p565_p12 = scmp.ne.s32.totalorder %s828_s17, %s564_s28  ;;  %s569_s30 = scalar_lea.hbm %s924_s0, 256 }
  0x4a   : > { %p570_p13 = scmp.lt.u32.totalorder %s828_s17, %s924_s0  ;;  %p571_p6 = scmp.lt.u32.totalorder %s569_s30, %s564_s28 }
  0x4b   : > { %p567_p2 = pnand %p566_p0, %p565_p12  ;;  %p573_p3 = scmp.lt.u32.totalorder %s564_s28, %s828_s17 }
  0x4c   : > { %p572_p10 = por %p571_p6, %p570_p13 }
  0x4d   : > { %p568_p1 = pneg %p567_p2 }
  0x4e   : > { %p574_p7 = por %p573_p3, %p572_p10 }
  0x50   : > { %p575_p9 = pnand %p574_p7, %p568_p1 }
  0x52   : > { %578 = shalt.err (!%p575_p9)
}
  0x53   : > { %s579_s8 = scalar_lea.vmem %s830_s24, 128  ;;  %s670_s9 = smov [#allocation2]  }
  0x54   : > { %p580_p12 = scmp.ne.s32.totalorder %s830_s24, %s579_s8  ;;  %s584_s25 = sshll.u32 %s670_s9, 4  ;;  %s585_s25 = int_to_ptr.vmem [resolvable:$false] %s584_s25 }
  0x55   : > { %s586_s10 = scalar_lea.vmem %s585_s25, 256  ;;  %p587_p4 = scmp.lt.s32.totalorder %s830_s24, %s585_s25 }
  0x56   : > { %p582_p2 = pnand %p580_p12, %p566_p0  ;;  %p588_p13 = scmp.lt.s32.totalorder %s586_s10, %s579_s8 }
  0x58   : > { %p583_p5 = pneg %p582_p2  ;;  %p589_p6 = por %p588_p13, %p587_p4 }
  0x5a   : > { %p590_p10 = pnand %p589_p6, %p583_p5 }
  0x5c   : > { %593 = shalt.err (!%p590_p10)
}
  0x5d   : > { %458 = dma.hbm_to_vmem [thread:$0]  (!%p832_p11), %s828_s17, 128, %s830_s24, %s157_s27  }
  0x5e   : > { %176 = sbr.rel (%p735_p8) target bundleno = 343 (0x157), region = 32  ;;  %s864_s11 = sand.u32 (!%p735_p8), 1, %s656_s13  }
  0x5f   : > { %s405_s21 = sshll.u32 (!%p735_p8), %s864_s11, 3  ;;  %s179_s28 = scalar_lea.sflag (!%p735_p8), [#allocation3], %s864_s11 }
  0x60   : > { %s182_s22 = scalar_lea.vmem (!%p735_p8), [#allocation2], %s405_s21  ;;  %p938_p4 = scmp.ne.s32.totalorder (!%p735_p8), %s931_s18, 0 }
  0x65   : > { %639 = dma.done.wait (%p938_p4), %s179_s28, 128  }
  0x66   : > { %641 = vsyncadd (%p938_p4), %s179_s28, 4294967168  ;;  %p939_p5 = scmp.eq.s32.totalorder %s716_s16, 0 }
  0x68   : > { %643 = dma.done.wait (%p939_p5), [#allocation6], 640   ;;  %p940_p11 = pmov %p939_p5 }
  0x69   : > { %v671_v0 = vmov 0.0|0.0   ;;  %vm672_vm0 = vmmov 0   ;;  %v673_v1 = vmov 0.0   ;;  %v214_v2 = vld [vmem:[#allocation5] sm:$0xff]  ;;  %v215_v3 = vld [vmem:[#allocation5 + $0x8] sm:$0xff]  ;;  %v216_v4 = vld [vmem:[#allocation5 + $0x10] sm:$0xff] }
  0x6a   : > { %645 = vsyncadd (%p940_p11), [#allocation6], 4294966656  ;;  %430 = vmatprep.subr.bf16.mxu0 %v671_v0  ;;  %427 = vmatprep.mubr.msk.f32.mxu0 %vm672_vm0, %v673_v1  ;;  %v431_v5 = vpack.c.bf16 %v215_v3, %v214_v2  ;;  %v217_v6 = vld [vmem:[#allocation5 + $0x18] sm:$0xff]  ;;  %vm219_vm1 = vcmask 261120   ;;  %v218_v9 = vld [vmem:[#allocation7] sm:$0xff]  ;;  %s411_s18 = sshll.u32 %s716_s16, 7 }
  0x6b   : > { %v434_v7 = vpack.c.bf16 %v217_v6, %v216_v4  ;;  %v213_v8 = vld [vmem:[%s182_s22] sm:$0xff]  ;;  %s212_s20 = scalar_lea.vmem [#allocation8], %s405_s21  ;;  %s880_s27 = scalar_lea.hbm %s927_s3, %s411_s18 }
  0x6c   : > { %432 = vmatpush3.bf16.msra.mxu0 %v431_v5  ;;  %s308_s17 = sshll.u32 %s212_s20, 4  ;;  %s295_s29 = scalar_lea.sflag [#allocation4], %s864_s11  ;;  %s882_s17 = int_to_ptr.vmem [resolvable:$true] %s308_s17 }
  0x6d   : > { %433 = vmatprep.subr.bf16.mxu0 %v671_v0  ;;  %s594_s30 = scalar_lea.vmem %s882_s17, 128  ;;  %p941_p0 = scmp.ne.s32.totalorder %s936_s6, 0 }
  0x6e   : > { %p595_p8 = scmp.ne.s32.totalorder %s882_s17, %s594_s30  ;;  %s674_s16 = smov [#allocation8]  }
  0x6f   : > { %s598_s23 = sshll.u32 %s674_s16, 4  ;;  %s599_s23 = int_to_ptr.vmem [resolvable:$false] %s598_s23 }
  0x70   : > { %435 = vmatpush3.bf16.msra.mxu0 %v434_v7  ;;  %p596_p1 = pnand %p595_p8, %p941_p0  ;;  %s600_s5 = scalar_lea.vmem %s599_s23, 256 }
  0x71   : > { %p601_p7 = scmp.lt.s32.totalorder %s882_s17, %s599_s23  ;;  %p602_p9 = scmp.lt.s32.totalorder %s600_s5, %s594_s30 }
  0x72   : > { %p597_p3 = pneg %p596_p1 }
  0x73   : > { %428 = vmatmul.mubr.msk.f32.vlgmr.msra.gmra.mrb[0].mxu0 %vm219_vm1, %v213_v8  ;;  %p603_p12 = por %p602_p9, %p601_p7 }
  0x75   : > { %p604_p2 = pnand %p603_p12, %p597_p3 }
 0x146   : > { %v289_v10 = vpop.f32.mrb[0].mxu0 }
 0x147   : > { %v290_v11 = vadd.f32 %v289_v10, %v218_v9  ;;  %v429_v12 = vpop.f32.mrb[1].mxu0 }
 0x149   : > { %293 = vst.msk [vmem:[%s212_s20] sm:$0xff] %vm219_vm1, %v290_v11 }
 0x14a   : > { %607 = shalt.err (!%p604_p2)
}
 0x14b   : > { %s608_s8 = scalar_lea.hbm %s880_s27, 128  ;;  %s612_s10 = scalar_lea.hbm %s927_s3, 256 }
 0x14c   : > { %p609_p13 = scmp.ne.s32.totalorder %s880_s27, %s608_s8  ;;  %p613_p4 = scmp.lt.u32.totalorder %s880_s27, %s927_s3 }
 0x14d   : > { %p614_p5 = scmp.lt.u32.totalorder %s612_s10, %s608_s8  ;;  %p616_p8 = scmp.lt.u32.totalorder %s608_s8, %s880_s27 }
 0x14e   : > { %p610_p6 = pnand %p609_p13, %p941_p0 }
 0x14f   : > { %p615_p11 = por %p614_p5, %p613_p4 }
 0x150   : > { %p611_p10 = pneg %p610_p6 }
 0x151   : > { %p617_p1 = por %p616_p8, %p615_p11 }
 0x153   : > { %p618_p3 = pnand %p617_p1, %p611_p10 }
 0x155   : > { %621 = shalt.err (!%p618_p3)
}
 0x156   : > { %446 = dma.vmem_to_hbm [thread:$0]  (%p941_p0), %s882_s17, 128, %s880_s27, %s295_s29  }
 0x157 PF: > { %s320_s28 = sand.u32 1, %s652_s12   ;;  %p942_p7 = scmp.ne.s32.totalorder %s932_s19, 0 }
 0x158   : > { %p943_p9 = scmp.ge.s32.totalorder %s664_s15, 2  ;;  %s321_s22 = scalar_lea.sflag [#allocation4], %s320_s28 }
 0x15a   : > { %p460_p12 = pnand %p943_p9, %p942_p7 }
 0x15c   : > { %647 = dma.done.wait (!%p460_p12), %s321_s22, 128  }
 0x15d   : > { %649 = vsyncadd (!%p460_p12), %s321_s22, 4294967168  ;;  %p17_p2 = scmp.ge.s32.totalorder %s805_s4, 4   ;;  %s944_s12 = smov %s656_s13 }
 0x15e   : > { %s945_s13 = smov %s660_s14  ;;  %s946_s14 = smov %s821_s7 }
 0x15f   : > { %s947_s15 = smov %s805_s4  ;;  %19 = sbr.rel (!%p17_p2) target bundleno = 6 (0x6), region = 85 }
 0x166   :  { %326 = vsyncpa [#allocation3], 1 }
 0x167   :  { %328 = vsyncpa [#allocation3 + $0x1], 1 }
 0x168   :  { %329 = vsyncpa [#allocation6], 1 }
 0x169   :  { %330 = vsyncpa [#allocation4], 1 }
 0x16a   :  { %332 = vsyncpa [#allocation4 + $0x1], 1 }

</bundles_post_ra>
